<compile_context>
chip_gen: v5e
topology: v5e:2x2
jax: 0.10.0
libtpu: 0.0.40
codegen_flags: <defaults>
</compile_context>

<pallas_src>
import math

import jax
import jax.numpy as jnp
from jax.experimental import pallas as pl
from jax.experimental.pallas import tpu as pltpu


# ----------------------------------------------------------------------------
# Kernel 1: mapping network  (LayerNorm -> depth x [Linear, LeakyReLU]) * 0.01
# Tiny (z_dim x z_dim) -> a single small kernel executed once.
# ----------------------------------------------------------------------------
def _vspec(shape):
    return pl.BlockSpec(tuple(shape), lambda i: (0,) * len(shape))


def mapping_kernel(z_ref, g_ref, b_ref, w_ref, wb_ref, o_ref):
    # z: (N, Z); g/b: (1, Z); w: (D, Z, Z) (applied as x @ W); wb: (D, 1, Z)
    z = z_ref[...]
    mu = jnp.mean(z, axis=-1, keepdims=True)
    var = jnp.mean((z - mu) ** 2, axis=-1, keepdims=True)
    h = (z - mu) * jax.lax.rsqrt(var + 1e-5) * g_ref[...] + b_ref[...]
    for i in range(w_ref.shape[0]):          # static unroll over mapping depth
        h = jnp.dot(h, w_ref[i], preferred_element_type=jnp.float32) + wb_ref[i]
        h = jnp.where(h >= 0.0, h, 0.2 * h)
    o_ref[...] = h * 0.01


def run_mapping(z, g, b, W, Wb):
    N, Z = z.shape
    return pl.pallas_call(
        mapping_kernel,
        out_shape=jax.ShapeDtypeStruct((N, Z), jnp.float32),
        grid=(1,),
        in_specs=[_vspec(z.shape), _vspec(g.shape), _vspec(b.shape),
                  _vspec(W.shape), _vspec(Wb.shape)],
        out_specs=_vspec((N, Z)),
    )(z, g, b, W, Wb)


# ----------------------------------------------------------------------------
# Kernel 2: fused generator block (+ fused 1x1 RGB out-conv), gridded over N.
# ----------------------------------------------------------------------------
def _conv3x3(y, w_ref, col_idx):
    """3x3 conv (pad=1) on an (H, W, C) f32 tile; bf16 MXU matmuls, f32 accum.

    kh: aligned leading-axis row slabs of a zero-row padded copy.
    kw: pltpu.roll (XLU) along the sublane axis + edge masks.
    """
    H, W, C = y.shape
    Co = w_ref.shape[-1]
    zrow = jnp.zeros((1, W, C), jnp.float32)
    ypad = jnp.concatenate([zrow, y, zrow], axis=0)           # (H+2, W, C)
    acc = jnp.zeros((H * W, Co), jnp.float32)
    for kh in range(3):
        row_slab = ypad[kh:kh + H]                            # aligned (H, W, C)
        for kw in range(3):
            dw = kw - 1
            if dw == 0:
                tap = row_slab
            else:
                tap = pltpu.roll(row_slab, shift=(-dw) % W, axis=1)
                valid = jnp.logical_and(col_idx + dw >= 0, col_idx + dw < W)
                tap = jnp.where(valid, tap, 0.0)
            acc = acc + jnp.dot(tap.reshape(H * W, C).astype(jnp.bfloat16),
                                w_ref[kh, kw],                # (C, Co) bf16
                                preferred_element_type=jnp.float32)
    return acc.reshape(H, W, Co)


def block_kernel(xu_ref, w_ref, swg_ref, sbg_ref, swb_ref, sbb_ref,
                 c1w_ref, c1b_ref, ns1_ref, c2w_ref, c2b_ref, ns2_ref,
                 ocw_ref, ocb_ref, n1_ref, n2_ref, x_out_ref, rgb_ref):
    _, H, W, Cin = xu_ref.shape
    Cout = x_out_ref.shape[-1]

    x = xu_ref[0]                                             # (H, W, Cin) f32
    wv = w_ref[...]                                           # (1, Z)

    # ---- AdaIN (instance norm + style modulation) + LeakyReLU ---------------
    gamma = jnp.dot(wv, swg_ref[...],
                    preferred_element_type=jnp.float32) + sbg_ref[...] + 1.0
    beta = jnp.dot(wv, swb_ref[...],
                   preferred_element_type=jnp.float32) + sbb_ref[...]
    xf = x.reshape(H * W, Cin)
    mu = jnp.mean(xf, axis=0, keepdims=True)
    var = jnp.mean((xf - mu) ** 2, axis=0, keepdims=True)
    yf = (xf - mu) * jax.lax.rsqrt(var + 1e-5) * gamma + beta
    yf = jnp.where(yf >= 0.0, yf, 0.2 * yf)
    y = yf.reshape(H, W, Cin)

    col_idx = jax.lax.broadcasted_iota(jnp.int32, (1, W, 1), 1)

    # ---- Conv3x3 -> + noise*scale -> LeakyReLU ------------------------------
    h1 = _conv3x3(y, c1w_ref, col_idx) + c1b_ref[...]
    h1 = h1 + n1_ref[0][:, :, None] * ns1_ref[...]
    h1 = jnp.where(h1 >= 0.0, h1, 0.2 * h1)

    # ---- Conv3x3 -> + noise*scale -------------------------------------------
    h2 = _conv3x3(h1, c2w_ref, col_idx) + c2b_ref[...]
    h2 = h2 + n2_ref[0][:, :, None] * ns2_ref[...]
    x_out_ref[0] = h2

    # ---- fused 1x1 RGB out-conv (lane-padded channels) ----------------------
    rgb = jnp.dot(h2.reshape(H * W, Cout), ocw_ref[...],
                  preferred_element_type=jnp.float32) + ocb_ref[...]
    rgb_ref[0] = rgb.reshape(H, W, rgb_ref.shape[-1])


def run_block(xu, w, blk, oc, n1, n2):
    N, H, W, Cin = xu.shape
    Z = w.shape[-1]
    Cout = blk['conv1_b'].shape[-1]
    CP = oc['w'].shape[-1]

    def per_n4(b): return (b, 0, 0, 0)
    def per_n3(b): return (b, 0, 0)
    def per_n2(b): return (b, 0)
    def const2(b): return (0, 0)
    def const4(b): return (0, 0, 0, 0)

    in_specs = [
        pl.BlockSpec((1, H, W, Cin), per_n4),       # upsampled block input
        pl.BlockSpec((1, Z), per_n2),               # style vector w
        pl.BlockSpec((Z, Cin), const2),             # style gamma weight
        pl.BlockSpec((1, Cin), const2),             # style gamma bias
        pl.BlockSpec((Z, Cin), const2),             # style beta weight
        pl.BlockSpec((1, Cin), const2),             # style beta bias
        pl.BlockSpec((3, 3, Cin, Cout), const4),    # conv1 weight (bf16)
        pl.BlockSpec((1, Cout), const2),            # conv1 bias
        pl.BlockSpec((1, Cout), const2),            # noise1 scale
        pl.BlockSpec((3, 3, Cout, Cout), const4),   # conv2 weight (bf16)
        pl.BlockSpec((1, Cout), const2),            # conv2 bias
        pl.BlockSpec((1, Cout), const2),            # noise2 scale
        pl.BlockSpec((Cout, CP), const2),           # 1x1 out-conv weight
        pl.BlockSpec((1, CP), const2),              # 1x1 out-conv bias
        pl.BlockSpec((1, H, W), per_n3),            # noise map 1
        pl.BlockSpec((1, H, W), per_n3),            # noise map 2
    ]
    out_specs = (pl.BlockSpec((1, H, W, Cout), per_n4),
                 pl.BlockSpec((1, H, W, CP), per_n4))
    out_shape = (jax.ShapeDtypeStruct((N, H, W, Cout), jnp.float32),
                 jax.ShapeDtypeStruct((N, H, W, CP), jnp.float32))
    return pl.pallas_call(
        block_kernel,
        out_shape=out_shape,
        grid=(N,),
        in_specs=in_specs,
        out_specs=out_specs,
        compiler_params=pltpu.CompilerParams(
            dimension_semantics=("parallel",),
            vmem_limit_bytes=32 * 1024 * 1024),
    )(xu, w, blk['style_wg'], blk['style_bg'], blk['style_wb'], blk['style_bb'],
      blk['conv1_w'], blk['conv1_b'], blk['noise1_scale'],
      blk['conv2_w'], blk['conv2_b'], blk['noise2_scale'],
      oc['w'], oc['b'], n1, n2)


# ----------------------------------------------------------------------------
# Plain-JAX glue
# ----------------------------------------------------------------------------
def upsample2x_nhwc(x):
    # nearest-neighbour x2 (nn.Upsample / F.interpolate default mode). Applied
    # to the block input in the wrapper: it commutes exactly with AdaIN+LReLU.
    return jnp.repeat(jnp.repeat(x, 2, axis=1), 2, axis=2)


def stylegan_generator(params, z, noise_key, img_channels):
    N = z.shape[0]
    w = run_mapping(z, params['ln_gamma'], params['ln_beta'],
                    params['map_w'], params['map_b'])
    x = jnp.broadcast_to(params['learned_input'], (N, 512, 4, 4))
    x = jnp.transpose(x, (0, 2, 3, 1))                       # NHWC
    keys = jax.random.split(noise_key, 2 * len(params['blocks']))

    out = None
    for i, (blk, oc) in enumerate(zip(params['blocks'], params['out_convs'])):
        xu = upsample2x_nhwc(x)
        _, H2, W2, _ = xu.shape
        n1 = jax.random.normal(keys[2 * i], (N, H2, W2), jnp.float32)
        n2 = jax.random.normal(keys[2 * i + 1], (N, H2, W2), jnp.float32)
        x, rgb = run_block(xu, w, blk, oc, n1, n2)
        out = rgb if out is None else upsample2x_nhwc(out) + rgb
    # drop the RGB lane padding and return NCHW like the PyTorch module
    return jnp.transpose(out[..., :img_channels], (0, 3, 1, 2))


# ----------------------------------------------------------------------------
# Deterministic parameter construction (shapes follow the module's __init__)
# ----------------------------------------------------------------------------
def init_params(key, img_size, img_channels, z_dim, base_dim, mapping_depth):
    depth = int(math.log2(img_size // 4))
    keys = iter(jax.random.split(key, 8 + 8 * depth))
    f32, bf16 = jnp.float32, jnp.bfloat16
    cp = max(8, -(-img_channels // 8) * 8)       # RGB lane padding (>= 8 lanes)
    params = {
        'ln_gamma': jnp.ones((1, z_dim), f32),
        'ln_beta': jnp.zeros((1, z_dim), f32),
        'map_w': jax.random.normal(next(keys), (mapping_depth, z_dim, z_dim), f32)
                 * (1.0 / math.sqrt(z_dim)),
        'map_b': jnp.zeros((mapping_depth, 1, z_dim), f32),
        'learned_input': jnp.ones((1, 512, 4, 4), f32),
        'blocks': [],
        'out_convs': [],
    }
    in_ch = 512
    for i in range(depth):
        out_ch = min(base_dim * img_size // 4 // 2 ** (i + 1), 512)
        blk = {
            'style_wg': jax.random.normal(next(keys), (z_dim, in_ch), f32)
                        * (1.0 / math.sqrt(z_dim)),
            'style_bg': jnp.zeros((1, in_ch), f32),
            'style_wb': jax.random.normal(next(keys), (z_dim, in_ch), f32)
                        * (1.0 / math.sqrt(z_dim)),
            'style_bb': jnp.zeros((1, in_ch), f32),
            'conv1_w': (jax.random.normal(next(keys), (3, 3, in_ch, out_ch), f32)
                        * math.sqrt(2.0 / (9 * in_ch))).astype(bf16),
            'conv1_b': jnp.zeros((1, out_ch), f32),
            'noise1_scale': jnp.zeros((1, out_ch), f32),   # Noise.scale init = 0
            'conv2_w': (jax.random.normal(next(keys), (3, 3, out_ch, out_ch), f32)
                        * math.sqrt(2.0 / (9 * out_ch))).astype(bf16),
            'conv2_b': jnp.zeros((1, out_ch), f32),
            'noise2_scale': jnp.zeros((1, out_ch), f32),
        }
        params['blocks'].append(blk)
        in_ch = out_ch
        ocw = jax.random.normal(next(keys), (in_ch, img_channels), f32) \
            * math.sqrt(2.0 / in_ch)
        ocw = jnp.concatenate(
            [ocw, jnp.zeros((in_ch, cp - img_channels), f32)], axis=-1)
        params['out_convs'].append({'w': ocw, 'b': jnp.zeros((1, cp), f32)})
    return params


if __name__ == "__main__":
    IMG_SIZE = 16        # -> depth = log2(16/4) = 2 generator blocks
    IMG_CHANNELS = 3
    Z_DIM = 32
    BASE_DIM = 16
    MAP_DEPTH = 8
    N = 2

    key = jax.random.PRNGKey(0)
    pkey, zkey, nkey = jax.random.split(key, 3)
    params = init_params(pkey, IMG_SIZE, IMG_CHANNELS, Z_DIM, BASE_DIM, MAP_DEPTH)
    z = jax.random.normal(zkey, (N, Z_DIM), jnp.float32)

    out = stylegan_generator(params, z, nkey, IMG_CHANNELS)
    out = jax.block_until_ready(out)
    assert out.shape == (N, IMG_CHANNELS, IMG_SIZE, IMG_SIZE), out.shape
    assert bool(jnp.all(jnp.isfinite(out)))
    print("KERNEL_OK")
</pallas_src>

<mosaic_0001>
module attributes {stable_mosaic.version = 11 : i64} {
  func.func @mapping_kernel(%arg0: i32, %arg1: memref<2x32xf32, #tpu.memory_space<vmem>>, %arg2: memref<1x32xf32, #tpu.memory_space<vmem>>, %arg3: memref<1x32xf32, #tpu.memory_space<vmem>>, %arg4: memref<8x32x32xf32, #tpu.memory_space<vmem>>, %arg5: memref<8x1x32xf32, #tpu.memory_space<vmem>>, %arg6: memref<2x32xf32, #tpu.memory_space<vmem>>) attributes {dimension_semantics = [#tpu.dimension_semantics<arbitrary>], iteration_bounds = array<i64: 1>, scalar_prefetch = 0 : i64, scratch_operands = 0 : i64, tpu.core_type = #tpu.core_type<tc>, window_params = [{pipeline_mode = #tpu.pipeline_mode<synchronous>, transform_indices = @transform_0, window_bounds = array<i64: 2, 32>}, {pipeline_mode = #tpu.pipeline_mode<synchronous>, transform_indices = @transform_1, window_bounds = array<i64: 1, 32>}, {pipeline_mode = #tpu.pipeline_mode<synchronous>, transform_indices = @transform_2, window_bounds = array<i64: 1, 32>}, {pipeline_mode = #tpu.pipeline_mode<synchronous>, transform_indices = @transform_3, window_bounds = array<i64: 8, 32, 32>}, {pipeline_mode = #tpu.pipeline_mode<synchronous>, transform_indices = @transform_4, window_bounds = array<i64: 8, 1, 32>}, {pipeline_mode = #tpu.pipeline_mode<synchronous>, transform_indices = @transform_5, window_bounds = array<i64: 2, 32>}]} {
    %c0 = arith.constant 0 : index
    %c0_0 = arith.constant 0 : index
    %0 = vector.load %arg1[%c0, %c0_0] : memref<2x32xf32, #tpu.memory_space<vmem>>, vector<2x32xf32>
    %cst = arith.constant dense<0.000000e+00> : vector<2xf32>
    %1 = vector.multi_reduction <add>, %0, %cst [1] : vector<2x32xf32> to vector<2xf32>
    %2 = vector.shape_cast %1 : vector<2xf32> to vector<2x1xf32>
    %cst_1 = arith.constant 3.200000e+01 : f32
    %3 = vector.broadcast %cst_1 : f32 to vector<2x1xf32>
    %4 = arith.divf %2, %3 : vector<2x1xf32>
    %5 = vector.broadcast %4 : vector<2x1xf32> to vector<2x32xf32>
    %6 = arith.subf %0, %5 : vector<2x32xf32>
    %7 = arith.mulf %6, %6 : vector<2x32xf32>
    %cst_2 = arith.constant dense<0.000000e+00> : vector<2xf32>
    %8 = vector.multi_reduction <add>, %7, %cst_2 [1] : vector<2x32xf32> to vector<2xf32>
    %9 = vector.shape_cast %8 : vector<2xf32> to vector<2x1xf32>
    %cst_3 = arith.constant 3.200000e+01 : f32
    %10 = vector.broadcast %cst_3 : f32 to vector<2x1xf32>
    %11 = arith.divf %9, %10 : vector<2x1xf32>
    %12 = vector.broadcast %4 : vector<2x1xf32> to vector<2x32xf32>
    %13 = arith.subf %0, %12 : vector<2x32xf32>
    %cst_4 = arith.constant 9.99999974E-6 : f32
    %14 = vector.broadcast %cst_4 : f32 to vector<2x1xf32>
    %15 = arith.addf %11, %14 : vector<2x1xf32>
    %16 = math.rsqrt %15 : vector<2x1xf32>
    %17 = vector.broadcast %16 : vector<2x1xf32> to vector<2x32xf32>
    %18 = arith.mulf %13, %17 : vector<2x32xf32>
    %c0_5 = arith.constant 0 : index
    %c0_6 = arith.constant 0 : index
    %19 = vector.load %arg2[%c0_5, %c0_6] : memref<1x32xf32, #tpu.memory_space<vmem>>, vector<1x32xf32>
    %20 = vector.broadcast %19 : vector<1x32xf32> to vector<2x32xf32>
    %21 = arith.mulf %18, %20 : vector<2x32xf32>
    %c0_7 = arith.constant 0 : index
    %c0_8 = arith.constant 0 : index
    %22 = vector.load %arg3[%c0_7, %c0_8] : memref<1x32xf32, #tpu.memory_space<vmem>>, vector<1x32xf32>
    %23 = vector.broadcast %22 : vector<1x32xf32> to vector<2x32xf32>
    %24 = arith.addf %21, %23 : vector<2x32xf32>
    %c0_9 = arith.constant 0 : index
    %c0_10 = arith.constant 0 : index
    %c0_11 = arith.constant 0 : index
    %25 = vector.load %arg4[%c0_9, %c0_10, %c0_11] : memref<8x32x32xf32, #tpu.memory_space<vmem>>, vector<1x32x32xf32>
    %26 = vector.shape_cast %25 : vector<1x32x32xf32> to vector<32x32xf32>
    %cst_12 = arith.constant dense<0.000000e+00> : vector<2x32xf32>
    %27 = tpu.matmul %24, %26, %cst_12 {dimension_numbers = #tpu.dot_dimension_numbers<[1], [0], [0], [1], [0, 0, 1, 1], [], []>} : vector<2x32xf32>, vector<32x32xf32>, vector<2x32xf32> -> vector<2x32xf32>
    %c0_13 = arith.constant 0 : index
    %c0_14 = arith.constant 0 : index
    %c0_15 = arith.constant 0 : index
    %28 = vector.load %arg5[%c0_13, %c0_14, %c0_15] : memref<8x1x32xf32, #tpu.memory_space<vmem>>, vector<1x1x32xf32>
    %29 = vector.shape_cast %28 : vector<1x1x32xf32> to vector<1x32xf32>
    %30 = vector.broadcast %29 : vector<1x32xf32> to vector<2x32xf32>
    %31 = arith.addf %27, %30 : vector<2x32xf32>
    %cst_16 = arith.constant 0.000000e+00 : f32
    %32 = vector.broadcast %cst_16 : f32 to vector<2x32xf32>
    %33 = arith.cmpf oge, %31, %32 : vector<2x32xf32>
    %cst_17 = arith.constant 2.000000e-01 : f32
    %34 = vector.broadcast %cst_17 : f32 to vector<2x32xf32>
    %35 = arith.mulf %34, %31 : vector<2x32xf32>
    %36 = arith.select %33, %31, %35 : vector<2x32xi1>, vector<2x32xf32>
    %c1 = arith.constant 1 : index
    %c0_18 = arith.constant 0 : index
    %c0_19 = arith.constant 0 : index
    %37 = vector.load %arg4[%c1, %c0_18, %c0_19] : memref<8x32x32xf32, #tpu.memory_space<vmem>>, vector<1x32x32xf32>
    %38 = vector.shape_cast %37 : vector<1x32x32xf32> to vector<32x32xf32>
    %cst_20 = arith.constant dense<0.000000e+00> : vector<2x32xf32>
    %39 = tpu.matmul %36, %38, %cst_20 {dimension_numbers = #tpu.dot_dimension_numbers<[1], [0], [0], [1], [0, 0, 1, 1], [], []>} : vector<2x32xf32>, vector<32x32xf32>, vector<2x32xf32> -> vector<2x32xf32>
    %c1_21 = arith.constant 1 : index
    %c0_22 = arith.constant 0 : index
    %c0_23 = arith.constant 0 : index
    %40 = vector.load %arg5[%c1_21, %c0_22, %c0_23] : memref<8x1x32xf32, #tpu.memory_space<vmem>>, vector<1x1x32xf32>
    %41 = vector.shape_cast %40 : vector<1x1x32xf32> to vector<1x32xf32>
    %42 = vector.broadcast %41 : vector<1x32xf32> to vector<2x32xf32>
    %43 = arith.addf %39, %42 : vector<2x32xf32>
    %cst_24 = arith.constant 0.000000e+00 : f32
    %44 = vector.broadcast %cst_24 : f32 to vector<2x32xf32>
    %45 = arith.cmpf oge, %43, %44 : vector<2x32xf32>
    %cst_25 = arith.constant 2.000000e-01 : f32
    %46 = vector.broadcast %cst_25 : f32 to vector<2x32xf32>
    %47 = arith.mulf %46, %43 : vector<2x32xf32>
    %48 = arith.select %45, %43, %47 : vector<2x32xi1>, vector<2x32xf32>
    %c2 = arith.constant 2 : index
    %c0_26 = arith.constant 0 : index
    %c0_27 = arith.constant 0 : index
    %49 = vector.load %arg4[%c2, %c0_26, %c0_27] : memref<8x32x32xf32, #tpu.memory_space<vmem>>, vector<1x32x32xf32>
    %50 = vector.shape_cast %49 : vector<1x32x32xf32> to vector<32x32xf32>
    %cst_28 = arith.constant dense<0.000000e+00> : vector<2x32xf32>
    %51 = tpu.matmul %48, %50, %cst_28 {dimension_numbers = #tpu.dot_dimension_numbers<[1], [0], [0], [1], [0, 0, 1, 1], [], []>} : vector<2x32xf32>, vector<32x32xf32>, vector<2x32xf32> -> vector<2x32xf32>
    %c2_29 = arith.constant 2 : index
    %c0_30 = arith.constant 0 : index
    %c0_31 = arith.constant 0 : index
    %52 = vector.load %arg5[%c2_29, %c0_30, %c0_31] : memref<8x1x32xf32, #tpu.memory_space<vmem>>, vector<1x1x32xf32>
    %53 = vector.shape_cast %52 : vector<1x1x32xf32> to vector<1x32xf32>
    %54 = vector.broadcast %53 : vector<1x32xf32> to vector<2x32xf32>
    %55 = arith.addf %51, %54 : vector<2x32xf32>
    %cst_32 = arith.constant 0.000000e+00 : f32
    %56 = vector.broadcast %cst_32 : f32 to vector<2x32xf32>
    %57 = arith.cmpf oge, %55, %56 : vector<2x32xf32>
    %cst_33 = arith.constant 2.000000e-01 : f32
    %58 = vector.broadcast %cst_33 : f32 to vector<2x32xf32>
    %59 = arith.mulf %58, %55 : vector<2x32xf32>
    %60 = arith.select %57, %55, %59 : vector<2x32xi1>, vector<2x32xf32>
    %c3 = arith.constant 3 : index
    %c0_34 = arith.constant 0 : index
    %c0_35 = arith.constant 0 : index
    %61 = vector.load %arg4[%c3, %c0_34, %c0_35] : memref<8x32x32xf32, #tpu.memory_space<vmem>>, vector<1x32x32xf32>
    %62 = vector.shape_cast %61 : vector<1x32x32xf32> to vector<32x32xf32>
    %cst_36 = arith.constant dense<0.000000e+00> : vector<2x32xf32>
    %63 = tpu.matmul %60, %62, %cst_36 {dimension_numbers = #tpu.dot_dimension_numbers<[1], [0], [0], [1], [0, 0, 1, 1], [], []>} : vector<2x32xf32>, vector<32x32xf32>, vector<2x32xf32> -> vector<2x32xf32>
    %c3_37 = arith.constant 3 : index
    %c0_38 = arith.constant 0 : index
    %c0_39 = arith.constant 0 : index
    %64 = vector.load %arg5[%c3_37, %c0_38, %c0_39] : memref<8x1x32xf32, #tpu.memory_space<vmem>>, vector<1x1x32xf32>
    %65 = vector.shape_cast %64 : vector<1x1x32xf32> to vector<1x32xf32>
    %66 = vector.broadcast %65 : vector<1x32xf32> to vector<2x32xf32>
    %67 = arith.addf %63, %66 : vector<2x32xf32>
    %cst_40 = arith.constant 0.000000e+00 : f32
    %68 = vector.broadcast %cst_40 : f32 to vector<2x32xf32>
    %69 = arith.cmpf oge, %67, %68 : vector<2x32xf32>
    %cst_41 = arith.constant 2.000000e-01 : f32
    %70 = vector.broadcast %cst_41 : f32 to vector<2x32xf32>
    %71 = arith.mulf %70, %67 : vector<2x32xf32>
    %72 = arith.select %69, %67, %71 : vector<2x32xi1>, vector<2x32xf32>
    %c4 = arith.constant 4 : index
    %c0_42 = arith.constant 0 : index
    %c0_43 = arith.constant 0 : index
    %73 = vector.load %arg4[%c4, %c0_42, %c0_43] : memref<8x32x32xf32, #tpu.memory_space<vmem>>, vector<1x32x32xf32>
    %74 = vector.shape_cast %73 : vector<1x32x32xf32> to vector<32x32xf32>
    %cst_44 = arith.constant dense<0.000000e+00> : vector<2x32xf32>
    %75 = tpu.matmul %72, %74, %cst_44 {dimension_numbers = #tpu.dot_dimension_numbers<[1], [0], [0], [1], [0, 0, 1, 1], [], []>} : vector<2x32xf32>, vector<32x32xf32>, vector<2x32xf32> -> vector<2x32xf32>
    %c4_45 = arith.constant 4 : index
    %c0_46 = arith.constant 0 : index
    %c0_47 = arith.constant 0 : index
    %76 = vector.load %arg5[%c4_45, %c0_46, %c0_47] : memref<8x1x32xf32, #tpu.memory_space<vmem>>, vector<1x1x32xf32>
    %77 = vector.shape_cast %76 : vector<1x1x32xf32> to vector<1x32xf32>
    %78 = vector.broadcast %77 : vector<1x32xf32> to vector<2x32xf32>
    %79 = arith.addf %75, %78 : vector<2x32xf32>
    %cst_48 = arith.constant 0.000000e+00 : f32
    %80 = vector.broadcast %cst_48 : f32 to vector<2x32xf32>
    %81 = arith.cmpf oge, %79, %80 : vector<2x32xf32>
    %cst_49 = arith.constant 2.000000e-01 : f32
    %82 = vector.broadcast %cst_49 : f32 to vector<2x32xf32>
    %83 = arith.mulf %82, %79 : vector<2x32xf32>
    %84 = arith.select %81, %79, %83 : vector<2x32xi1>, vector<2x32xf32>
    %c5 = arith.constant 5 : index
    %c0_50 = arith.constant 0 : index
    %c0_51 = arith.constant 0 : index
    %85 = vector.load %arg4[%c5, %c0_50, %c0_51] : memref<8x32x32xf32, #tpu.memory_space<vmem>>, vector<1x32x32xf32>
    %86 = vector.shape_cast %85 : vector<1x32x32xf32> to vector<32x32xf32>
    %cst_52 = arith.constant dense<0.000000e+00> : vector<2x32xf32>
    %87 = tpu.matmul %84, %86, %cst_52 {dimension_numbers = #tpu.dot_dimension_numbers<[1], [0], [0], [1], [0, 0, 1, 1], [], []>} : vector<2x32xf32>, vector<32x32xf32>, vector<2x32xf32> -> vector<2x32xf32>
    %c5_53 = arith.constant 5 : index
    %c0_54 = arith.constant 0 : index
    %c0_55 = arith.constant 0 : index
    %88 = vector.load %arg5[%c5_53, %c0_54, %c0_55] : memref<8x1x32xf32, #tpu.memory_space<vmem>>, vector<1x1x32xf32>
    %89 = vector.shape_cast %88 : vector<1x1x32xf32> to vector<1x32xf32>
    %90 = vector.broadcast %89 : vector<1x32xf32> to vector<2x32xf32>
    %91 = arith.addf %87, %90 : vector<2x32xf32>
    %cst_56 = arith.constant 0.000000e+00 : f32
    %92 = vector.broadcast %cst_56 : f32 to vector<2x32xf32>
    %93 = arith.cmpf oge, %91, %92 : vector<2x32xf32>
    %cst_57 = arith.constant 2.000000e-01 : f32
    %94 = vector.broadcast %cst_57 : f32 to vector<2x32xf32>
    %95 = arith.mulf %94, %91 : vector<2x32xf32>
    %96 = arith.select %93, %91, %95 : vector<2x32xi1>, vector<2x32xf32>
    %c6 = arith.constant 6 : index
    %c0_58 = arith.constant 0 : index
    %c0_59 = arith.constant 0 : index
    %97 = vector.load %arg4[%c6, %c0_58, %c0_59] : memref<8x32x32xf32, #tpu.memory_space<vmem>>, vector<1x32x32xf32>
    %98 = vector.shape_cast %97 : vector<1x32x32xf32> to vector<32x32xf32>
    %cst_60 = arith.constant dense<0.000000e+00> : vector<2x32xf32>
    %99 = tpu.matmul %96, %98, %cst_60 {dimension_numbers = #tpu.dot_dimension_numbers<[1], [0], [0], [1], [0, 0, 1, 1], [], []>} : vector<2x32xf32>, vector<32x32xf32>, vector<2x32xf32> -> vector<2x32xf32>
    %c6_61 = arith.constant 6 : index
    %c0_62 = arith.constant 0 : index
    %c0_63 = arith.constant 0 : index
    %100 = vector.load %arg5[%c6_61, %c0_62, %c0_63] : memref<8x1x32xf32, #tpu.memory_space<vmem>>, vector<1x1x32xf32>
    %101 = vector.shape_cast %100 : vector<1x1x32xf32> to vector<1x32xf32>
    %102 = vector.broadcast %101 : vector<1x32xf32> to vector<2x32xf32>
    %103 = arith.addf %99, %102 : vector<2x32xf32>
    %cst_64 = arith.constant 0.000000e+00 : f32
    %104 = vector.broadcast %cst_64 : f32 to vector<2x32xf32>
    %105 = arith.cmpf oge, %103, %104 : vector<2x32xf32>
    %cst_65 = arith.constant 2.000000e-01 : f32
    %106 = vector.broadcast %cst_65 : f32 to vector<2x32xf32>
    %107 = arith.mulf %106, %103 : vector<2x32xf32>
    %108 = arith.select %105, %103, %107 : vector<2x32xi1>, vector<2x32xf32>
    %c7 = arith.constant 7 : index
    %c0_66 = arith.constant 0 : index
    %c0_67 = arith.constant 0 : index
    %109 = vector.load %arg4[%c7, %c0_66, %c0_67] : memref<8x32x32xf32, #tpu.memory_space<vmem>>, vector<1x32x32xf32>
    %110 = vector.shape_cast %109 : vector<1x32x32xf32> to vector<32x32xf32>
    %cst_68 = arith.constant dense<0.000000e+00> : vector<2x32xf32>
    %111 = tpu.matmul %108, %110, %cst_68 {dimension_numbers = #tpu.dot_dimension_numbers<[1], [0], [0], [1], [0, 0, 1, 1], [], []>} : vector<2x32xf32>, vector<32x32xf32>, vector<2x32xf32> -> vector<2x32xf32>
    %c7_69 = arith.constant 7 : index
    %c0_70 = arith.constant 0 : index
    %c0_71 = arith.constant 0 : index
    %112 = vector.load %arg5[%c7_69, %c0_70, %c0_71] : memref<8x1x32xf32, #tpu.memory_space<vmem>>, vector<1x1x32xf32>
    %113 = vector.shape_cast %112 : vector<1x1x32xf32> to vector<1x32xf32>
    %114 = vector.broadcast %113 : vector<1x32xf32> to vector<2x32xf32>
    %115 = arith.addf %111, %114 : vector<2x32xf32>
    %cst_72 = arith.constant 0.000000e+00 : f32
    %116 = vector.broadcast %cst_72 : f32 to vector<2x32xf32>
    %117 = arith.cmpf oge, %115, %116 : vector<2x32xf32>
    %cst_73 = arith.constant 2.000000e-01 : f32
    %118 = vector.broadcast %cst_73 : f32 to vector<2x32xf32>
    %119 = arith.mulf %118, %115 : vector<2x32xf32>
    %120 = arith.select %117, %115, %119 : vector<2x32xi1>, vector<2x32xf32>
    %cst_74 = arith.constant 0.00999999977 : f32
    %121 = vector.broadcast %cst_74 : f32 to vector<2x32xf32>
    %122 = arith.mulf %120, %121 : vector<2x32xf32>
    %c0_75 = arith.constant 0 : index
    %c0_76 = arith.constant 0 : index
    %123 = vector.load %arg6[%c0_75, %c0_76] : memref<2x32xf32, #tpu.memory_space<vmem>>, vector<2x32xf32>
    tpu.vector_store %arg6[%c0_75, %c0_76], %122 {strides = array<i32>} : memref<2x32xf32, #tpu.memory_space<vmem>>, vector<2x32xf32>,
    return
  }
  func.func @transform_0(%arg0: i32) -> (i32, i32) {
    %c0_i32 = arith.constant 0 : i32
    %c0_i32_0 = arith.constant 0 : i32
    %c0_i32_1 = arith.constant 0 : i32
    return %c0_i32, %c0_i32_0 : i32, i32
  }
  func.func @transform_1(%arg0: i32) -> (i32, i32) {
    %c0_i32 = arith.constant 0 : i32
    %c0_i32_0 = arith.constant 0 : i32
    %c0_i32_1 = arith.constant 0 : i32
    return %c0_i32, %c0_i32_0 : i32, i32
  }
  func.func @transform_2(%arg0: i32) -> (i32, i32) {
    %c0_i32 = arith.constant 0 : i32
    %c0_i32_0 = arith.constant 0 : i32
    %c0_i32_1 = arith.constant 0 : i32
    return %c0_i32, %c0_i32_0 : i32, i32
  }
  func.func @transform_3(%arg0: i32) -> (i32, i32, i32) {
    %c0_i32 = arith.constant 0 : i32
    %c0_i32_0 = arith.constant 0 : i32
    %c0_i32_1 = arith.constant 0 : i32
    %c0_i32_2 = arith.constant 0 : i32
    return %c0_i32, %c0_i32_0, %c0_i32_1 : i32, i32, i32
  }
  func.func @transform_4(%arg0: i32) -> (i32, i32, i32) {
    %c0_i32 = arith.constant 0 : i32
    %c0_i32_0 = arith.constant 0 : i32
    %c0_i32_1 = arith.constant 0 : i32
    %c0_i32_2 = arith.constant 0 : i32
    return %c0_i32, %c0_i32_0, %c0_i32_1 : i32, i32, i32
  }
  func.func @transform_5(%arg0: i32) -> (i32, i32) {
    %c0_i32 = arith.constant 0 : i32
    %c0_i32_0 = arith.constant 0 : i32
    %c0_i32_1 = arith.constant 0 : i32
    return %c0_i32, %c0_i32_0 : i32, i32
  }
}

</mosaic_0001>

<bundles_post_ra>
// kernel: tpu_custom_call.1
= control target key start
LH: loop header
LB: loop body
LE: loop exit
PB: predicated region body
PF: predicated region fallthrough
CT: control target
= control target key end

     0   :  { %10 = vsyncpa [#allocation3], 0  ;;  %s658_s0 = inlined_call_operand.hbm [shape: f32[2,32], index: 0, kind: input, shape index: {}]   ;;  %s659_s1 = inlined_call_operand.hbm [shape: f32[1,32], index: 1, kind: input, shape index: {}]   ;;  %s660_s2 = inlined_call_operand.vmem [shape: f32[1,32], index: 2, kind: input, shape index: {}]   ;;  %s661_s3 = inlined_call_operand.hbm [shape: f32[8,32,32], index: 3, kind: input, shape index: {}]   ;;  %s662_s4 = inlined_call_operand.hbm [shape: f32[8,1,32], index: 4, kind: input, shape index: {}]   ;;  %s663_s5 = inlined_call_operand.hbm [shape: f32[2,32], index: 5, kind: output, shape index: {}]  }
   0x1   :  { %11 = vsyncpa [#allocation6], 0 }
   0x2   :  { %12 = vsyncpa [#allocation9], 0  ;;  %s30_s20 = sshll.u32 %s659_s1, 4  ;;  %s31_s20 = int_to_ptr.hbm [resolvable:$true] %s30_s20 }
   0x3   :  { %13 = vsyncpa [#allocation4], 0  ;;  %s589_s21 = smov [#allocation5]   ;;  %s19_s25 = sshll.u32 %s658_s0, 4  ;;  %s20_s25 = int_to_ptr.hbm [resolvable:$true] %s19_s25 }
   0x4   :  { %s32_s22 = sshll.u32 %s589_s21, 4  ;;  %s590_s26 = smov [#allocation2]   ;;  %s33_s22 = int_to_ptr.vmem [resolvable:$true] %s32_s22 }
   0x5   :  { %35 = dma.hbm_to_vmem [thread:$0]  %s31_s20, 16, %s33_s22, [#allocation6]  }
   0x6   :  { %s21_s27 = sshll.u32 %s590_s26, 4  ;;  %s42_s30 = sshll.u32 %s661_s3, 4  ;;  %s22_s27 = int_to_ptr.vmem [resolvable:$true] %s21_s27  ;;  %s43_s30 = int_to_ptr.hbm [resolvable:$true] %s42_s30 }
   0x7   :  { %24 = dma.hbm_to_vmem [thread:$0]  %s20_s25, 32, %s22_s27, [#allocation3]  }
   0x8   :  { %s591_s1 = smov [#allocation7]   ;;  %s55_s9 = sshll.u32 %s662_s4, 4  ;;  %s56_s9 = int_to_ptr.hbm [resolvable:$true] %s55_s9 }
   0x9   :  { %s44_s6 = sshll.u32 %s591_s1, 4  ;;  %s592_s10 = smov 128   ;;  %s45_s6 = int_to_ptr.vmem [resolvable:$true] %s44_s6 }
   0xa   :  { %s593_s0 = smov 8   ;;  %s594_s11 = smov [#allocation8]  }
   0xb   :  { %50 = dma.hbm_to_vmem [thread:$0]  %s43_s30, 4096, %s45_s6, [#allocation6], %s592_s10, %s592_s10, %s593_s0  }
   0xc   :  { %s57_s12 = sshll.u32 %s594_s11, 4  ;;  %s595_s13 = smov 16   ;;  %s58_s12 = int_to_ptr.vmem [resolvable:$true] %s57_s12 }
   0xd   :  { %s596_s14 = smov 1  }
   0xe   :  { %63 = dma.hbm_to_vmem [thread:$0]  %s56_s9, 128, %s58_s12, [#allocation9], %s595_s13, %s595_s13, %s596_s14  }
   0xf   :  { %581 = dma.done.wait [#allocation3], 32  }
  0x10   :  { %582 = vsyncadd [#allocation3], 4294967264 }
  0x11   :  { %583 = dma.done.wait [#allocation6], 4112  }
  0x12   :  { %584 = vsyncadd [#allocation6], 4294963184 }
  0x13   :  { %585 = dma.done.wait [#allocation9], 128  }
  0x14   :  { %586 = vsyncadd [#allocation9], 4294967168  ;;  %vm81_vm0 = vcmask 254976   ;;  %v80_v0 = vld [vmem:[#allocation2] sm:$0x3]  ;;  %v597_v2 = vmov 32.0  }
  0x15   :  { %v82_v1 = vsel %vm81_vm0, %v80_v0, 0.0  ;;  %457 = vrcp.f32 %v597_v2  ;;  %v124_v14 = vld [vmem:[#allocation7 + $0x18] sm:$0xff]  ;;  %v123_v15 = vld [vmem:[#allocation7 + $0x10] sm:$0xff]  ;;  %v122_v16 = vld [vmem:[#allocation7 + $0x8] sm:$0xff]  ;;  %vm129_vm5 = vcmask 261120   ;;  %s417_s18 = sshll.u32 %s663_s5, 4  ;;  %s418_s18 = int_to_ptr.hbm [resolvable:$true] %s417_s18 }
  0x16   :  { %83 = vadd.xlane.f32.xlu0 %v82_v1  ;;  %145 = vmatpush.msra.mxu0 %v124_v14  ;;  %v121_v17 = vld [vmem:[#allocation7] sm:$0xff]  ;;  %v160_v18 = vld [vmem:[#allocation7 + $0x38] sm:$0xff]  ;;  %v159_v34 = vld [vmem:[#allocation7 + $0x30] sm:$0xff] }
  0x17   :  { %181 = vmatpush.msra.mxu1 %v160_v18  ;;  %v447_v28 = vld [vmem:[#allocation5] ss:$0 sm:$0xff]  ;;  %v448_v31 = vld [vmem:[%s660_s2] ss:$0 sm:$0xff]  ;;  %v158_v35 = vld [vmem:[#allocation7 + $0x28] sm:$0xff]  ;;  %s598_s2 = smov [#allocation10]  }
  0x18   :  { %146 = vmatpush.msra.mxu0 %v123_v15  ;;  %v157_v36 = vld [vmem:[#allocation7 + $0x20] sm:$0xff]  ;;  %v196_v37 = vld [vmem:[#allocation7 + $0x58] sm:$0xff]  ;;  %v195_v43 = vld [vmem:[#allocation7 + $0x50] sm:$0xff]  ;;  %s415_s15 = sshll.u32 %s598_s2, 4  ;;  %s416_s15 = int_to_ptr.vmem [resolvable:$true] %s415_s15 }
  0x19   :  { %182 = vmatpush.msra.mxu1 %v159_v34  ;;  %217 = vmatpush.msra.mxu2 %v196_v37  ;;  %v449_v38 = vld [vmem:[#allocation8] ss:$0 sm:$0xff]  ;;  %v194_v44 = vld [vmem:[#allocation7 + $0x48] sm:$0xff]  ;;  %v232_v46 = vld [vmem:[#allocation7 + $0x78] sm:$0xff] }
  0x1a   :  { %147 = vmatpush.msra.mxu0 %v122_v16  ;;  %v193_v45 = vld [vmem:[#allocation7 + $0x40] sm:$0xff]  ;;  %253 = vmatpush.msra.mxu3 %v232_v46  ;;  %v231_v52 = vld [vmem:[#allocation7 + $0x70] sm:$0xff]  ;;  %v230_v53 = vld [vmem:[#allocation7 + $0x68] sm:$0xff] }
  0x1b   :  { %v458_v3 = vpop.eup %457  ;;  %183 = vmatpush.msra.mxu1 %v158_v35  ;;  %218 = vmatpush.msra.mxu2 %v195_v43  ;;  %v450_v47 = vld [vmem:[#allocation8 + $0x1] ss:$0 sm:$0xff]  ;;  %v268_v55 = vld [vmem:[#allocation7 + $0x98] sm:$0xff]  ;;  %v451_v56 = vld [vmem:[#allocation8 + $0x2] ss:$0 sm:$0xff] }
  0x1c   :  { %v86_v4 = vmul.f32 32.0, %v458_v3  ;;  %vm90_vm1 = vweird.f32 %v458_v3  ;;  %148 = vmatpush.msra.mxu0 %v121_v17  ;;  %254 = vmatpush.msra.mxu3 %v231_v52  ;;  %v229_v54 = vld [vmem:[#allocation7 + $0x60] sm:$0xff]  ;;  %v267_v61 = vld [vmem:[#allocation7 + $0x90] sm:$0xff]  ;;  %v266_v62 = vld [vmem:[#allocation7 + $0x88] sm:$0xff] }
  0x1d   :  { %184 = vmatpush.msra.mxu1 %v157_v36  ;;  %219 = vmatpush.msra.mxu2 %v194_v44  ;;  %v265_v63 = vld [vmem:[#allocation7 + $0x80] sm:$0xff]  ;;  %v339_v15 = vld [vmem:[#allocation7 + $0xd0] sm:$0xff]  ;;  %v338_v16 = vld [vmem:[#allocation7 + $0xc8] sm:$0xff] }
  0x1e   :  { %v87_v5 = vsub.f32 1.0, %v86_v4  ;;  %255 = vmatpush.msra.mxu3 %v230_v53  ;;  %289 = vmatpush.msrb.mxu0 %v268_v55  ;;  %v452_v1 = vld [vmem:[#allocation8 + $0x3] ss:$0 sm:$0xff]  ;;  %v376_v18 = vld [vmem:[#allocation7 + $0xf8] sm:$0xff] }
  0x1f   :  { %220 = vmatpush.msra.mxu2 %v193_v45  ;;  %v337_v17 = vld [vmem:[#allocation7 + $0xc0] sm:$0xff] }
  0x20   :  { %v88_v6 = vmul.f32 %v458_v3, %v87_v5  ;;  %256 = vmatpush.msra.mxu3 %v229_v54  ;;  %290 = vmatpush.msrb.mxu0 %v267_v61 }
  0x22   :  { %v89_v7 = vadd.f32 %v458_v3, %v88_v6  ;;  %291 = vmatpush.msrb.mxu0 %v266_v62  ;;  %v303_v6 = vld [vmem:[#allocation7 + $0xb0] sm:$0xff]  ;;  %397 = vmatpush.msrb.mxu3 %v376_v18 }
  0x24   :  { %v91_v8 = vsel %vm90_vm1, %v458_v3, %v89_v7  ;;  %292 = vmatpush.msrb.mxu0 %v265_v63  ;;  %v302_v7 = vld [vmem:[#allocation7 + $0xa8] sm:$0xff] }
  0x89   :  { %v84_v9 = vpop.xlane.xlu0 %83 }
  0x8a   :  { %v92_v10 = vmul.f32 %v91_v8, %v84_v9  ;;  %v340_v9 = vld [vmem:[#allocation7 + $0xd8] sm:$0xff] }
  0x8b   :  { %361 = vmatpush.msrb.mxu2 %v340_v9 }
  0x8c   :  { %v93_v11 = vsub.f32 %v80_v0, %v92_v10  ;;  %v304_v0 = vld [vmem:[#allocation7 + $0xb8] sm:$0xff]  ;;  %v453_v10 = vld [vmem:[#allocation8 + $0x4] ss:$0 sm:$0xff] }
  0x8d   :  { %325 = vmatpush.msrb.mxu1 %v304_v0  ;;  %362 = vmatpush.msrb.mxu2 %v339_v15 }
  0x8e   :  { %v94_v12 = vmul.f32 %v93_v11, %v93_v11 }
  0x8f   :  { %326 = vmatpush.msrb.mxu1 %v303_v6  ;;  %363 = vmatpush.msrb.mxu2 %v338_v16 }
  0x90   :  { %v95_v13 = vsel %vm81_vm0, %v94_v12, 0.0 }
  0x91   :  { %96 = vadd.xlane.f32.xlu0 %v95_v13  ;;  %327 = vmatpush.msrb.mxu1 %v302_v7 }
  0x92   :  { %364 = vmatpush.msrb.mxu2 %v337_v17 }
 0x104   :  { %v97_v19 = vpop.xlane.xlu0 %96 }
 0x105   :  { %v98_v20 = vmul.f32 %v97_v19, %v91_v8  ;;  %v301_v8 = vld [vmem:[#allocation7 + $0xa0] sm:$0xff] }
 0x106   :  { %328 = vmatpush.msrb.mxu1 %v301_v8  ;;  %v454_v19 = vld [vmem:[#allocation8 + $0x5] ss:$0 sm:$0xff] }
 0x107   :  { %v99_v21 = vadd.f32 1e-05, %v98_v20 }
 0x109   :  { %459 = vrsqrt.f32 %v99_v21  ;;  %vm106_vm3 = vweird.f32 %v99_v21 }
 0x10f   :  { %v460_v22 = vpop.eup %459 }
 0x110   :  { %v101_v23 = vmul.f32 %v460_v22, %v99_v21  ;;  %vm107_vm2 = vweird.f32 %v460_v22 }
 0x111   :  { %vm108_vm4 = vmor %vm106_vm3, %vm107_vm2 }
 0x112   :  { %v102_v24 = vmul.f32 %v460_v22, %v101_v23 }
 0x114   :  { %v103_v25 = vmul.f32 0.5, %v102_v24  ;;  %v375_v24 = vld [vmem:[#allocation7 + $0xf0] sm:$0xff] }
 0x115   :  { %398 = vmatpush.msrb.mxu3 %v375_v24 }
 0x116   :  { %v104_v26 = vsub.f32 1.5, %v103_v25  ;;  %v374_v25 = vld [vmem:[#allocation7 + $0xe8] sm:$0xff] }
 0x117   :  { %399 = vmatpush.msrb.mxu3 %v374_v25 }
 0x118   :  { %v105_v27 = vmul.f32 %v460_v22, %v104_v26  ;;  %v373_v26 = vld [vmem:[#allocation7 + $0xe0] sm:$0xff] }
 0x119   :  { %400 = vmatpush.msrb.mxu3 %v373_v26 }
 0x11a   :  { %v109_v29 = vsel %vm108_vm4, %v460_v22, %v105_v27  ;;  %v455_v27 = vld [vmem:[#allocation8 + $0x6] ss:$0 sm:$0xff] }
 0x11b   :  { %v110_v30 = vmul.f32 %v109_v29, %v93_v11 }
 0x11d   :  { %v115_v32 = vmul.f32 %v447_v28, %v110_v30 }
 0x11f   :  { %v120_v33 = vadd.f32 %v448_v31, %v115_v32  ;;  %v456_v32 = vld [vmem:[#allocation8 + $0x7] ss:$0 sm:$0xff] }
 0x121   :  { %429 = vmatmul.msk.f32.vlgmr.msra.gmra.mxu0 %vm129_vm5, %v120_v33 }
 0x19e   :  { %v150_v39 = vpop.f32.mrf.mxu0 }
 0x19f   :  { %v151_v40 = vadd.f32 %v449_v38, %v150_v39 }
 0x1a1   :  { %v154_v41 = vmul.f32 0.2, %v151_v40  ;;  %vm153_vm6 = vcmp.ge.f32.partialorder %v151_v40, 0.0 }
 0x1a3   :  { %v155_v42 = vsel %vm153_vm6, %v151_v40, %v154_v41 }
 0x1a4   :  { %430 = vmatmul.msk.f32.vlgmr.msra.gmra.mxu1 %vm129_vm5, %v155_v42 }
 0x221   :  { %v186_v48 = vpop.f32.mrf.mxu1 }
 0x222   :  { %v187_v49 = vadd.f32 %v450_v47, %v186_v48 }
 0x224   :  { %v190_v50 = vmul.f32 0.2, %v187_v49  ;;  %vm189_vm7 = vcmp.ge.f32.partialorder %v187_v49, 0.0 }
 0x226   :  { %v191_v51 = vsel %vm189_vm7, %v187_v49, %v190_v50 }
 0x227   :  { %431 = vmatmul.msk.f32.vlgmr.msra.gmra.mxu2 %vm129_vm5, %v191_v51 }
 0x2aa   :  { %v222_v57 = vpop.f32.mrf.mxu2 }
 0x2ab   :  { %v223_v58 = vadd.f32 %v451_v56, %v222_v57 }
 0x2ad   :  { %v226_v59 = vmul.f32 0.2, %v223_v58  ;;  %vm225_vm8 = vcmp.ge.f32.partialorder %v223_v58, 0.0 }
 0x2af   :  { %v227_v60 = vsel %vm225_vm8, %v223_v58, %v226_v59 }
 0x2b0   :  { %432 = vmatmul.msk.f32.vlgmr.msra.gmra.mxu3 %vm129_vm5, %v227_v60 }
 0x333   :  { %v258_v2 = vpop.f32.mrf.mxu3 }
 0x334   :  { %v259_v3 = vadd.f32 %v452_v1, %v258_v2 }
 0x336   :  { %vm261_vm9 = vcmp.ge.f32.partialorder %v259_v3, 0.0  ;;  %v262_v4 = vmul.f32 0.2, %v259_v3 }
 0x338   :  { %v263_v5 = vsel %vm261_vm9, %v259_v3, %v262_v4 }
 0x339   :  { %433 = vmatmul.msk.f32.vlgmr.msrb.gmra.mxu0 %vm129_vm5, %v263_v5 }
 0x3b6   :  { %v294_v11 = vpop.f32.mrf.mxu0 }
 0x3b7   :  { %v295_v12 = vadd.f32 %v453_v10, %v294_v11 }
 0x3b9   :  { %vm297_vm10 = vcmp.ge.f32.partialorder %v295_v12, 0.0  ;;  %v298_v13 = vmul.f32 0.2, %v295_v12 }
 0x3bb   :  { %v299_v14 = vsel %vm297_vm10, %v295_v12, %v298_v13 }
 0x3bc   :  { %434 = vmatmul.msk.f32.vlgmr.msrb.gmra.mxu1 %vm129_vm5, %v299_v14 }
 0x439   :  { %v330_v20 = vpop.f32.mrf.mxu1 }
 0x43a   :  { %v331_v21 = vadd.f32 %v454_v19, %v330_v20 }
 0x43c   :  { %vm333_vm11 = vcmp.ge.f32.partialorder %v331_v21, 0.0  ;;  %v334_v22 = vmul.f32 0.2, %v331_v21 }
 0x43e   :  { %v335_v23 = vsel %vm333_vm11, %v331_v21, %v334_v22 }
 0x43f   :  { %435 = vmatmul.msk.f32.vlgmr.msrb.gmra.mxu2 %vm129_vm5, %v335_v23 }
 0x4c2   :  { %v366_v28 = vpop.f32.mrf.mxu2 }
 0x4c3   :  { %v367_v29 = vadd.f32 %v455_v27, %v366_v28 }
 0x4c5   :  { %vm369_vm12 = vcmp.ge.f32.partialorder %v367_v29, 0.0  ;;  %v370_v30 = vmul.f32 0.2, %v367_v29 }
 0x4c7   :  { %v371_v31 = vsel %vm369_vm12, %v367_v29, %v370_v30 }
 0x4c8   :  { %436 = vmatmul.msk.f32.vlgmr.msrb.gmra.mxu3 %vm129_vm5, %v371_v31 }
 0x54b   :  { %v402_v33 = vpop.f32.mrf.mxu3 }
 0x54c   :  { %v403_v34 = vadd.f32 %v456_v32, %v402_v33 }
 0x54e   :  { %vm405_vm13 = vcmp.ge.f32.partialorder %v403_v34, 0.0  ;;  %v406_v35 = vmul.f32 0.2, %v403_v34 }
 0x550   :  { %v407_v36 = vsel %vm405_vm13, %v403_v34, %v406_v35 }
 0x551   :  { %v408_v37 = vmul.f32 0.01, %v407_v36 }
 0x553   :  { %409 = vst.msk [vmem:[#allocation10] sm:$0x3] %vm81_vm0, %v408_v37 }
 0x554   :  { %420 = dma.vmem_to_hbm [thread:$0]  %s416_s15, 32, %s418_s18, [#allocation4]  }
 0x555   :  { %587 = dma.done.wait [#allocation4], 32  }
 0x556   :  { %588 = vsyncadd [#allocation4], 4294967264 }
 0x557   :  { %425 = vsyncpa [#allocation3], 1 }
 0x558   :  { %426 = vsyncpa [#allocation6], 1 }
 0x559   :  { %427 = vsyncpa [#allocation9], 1 }
 0x55a   :  { %428 = vsyncpa [#allocation4], 1 }

</bundles_post_ra>
